<compile_context>
chip_gen: v6e
topology: v6e:2x2x1
jax: 0.10.0
libtpu: 0.0.40
codegen_flags: <defaults>
</compile_context>

<pallas_src>
import functools

import jax
import jax.numpy as jnp
from jax.experimental import pallas as pl
from jax.experimental.pallas import tpu as pltpu


def _round_up(n, m):
    return ((n + m - 1) // m) * m


def _actor_critic_kernel(
    x_ref,
    w1_ref, b1_ref,          # fused layer 1: (S, 2H), (1, 2H)
    w2_ref, b2_ref,          # fused block-diag layer 2: (2H, 2H), (1, 2H)
    w3c_ref, b3c_ref,        # critic layer 3: (H, H), (1, H)
    wh_ref, bh_ref,          # fused head: (2H, 128), (1, 128)
    out_ref,                 # packed output: (TILE_B, 128)
    *, action_size, n_hidden,
):
    x = x_ref[...].astype(jnp.float32)

    # Fused layer 1: [actor | critic] in one MXU pass.
    hc = jnp.tanh(
        jnp.dot(x, w1_ref[...], preferred_element_type=jnp.float32) + b1_ref[...]
    )
    # Fused layer 2: block-diagonal weight keeps branches independent.
    hc = jnp.tanh(
        jnp.dot(hc, w2_ref[...], preferred_element_type=jnp.float32) + b2_ref[...]
    )
    h2 = hc[:, :n_hidden]            # actor hidden 2
    c2 = hc[:, n_hidden:]            # critic hidden 2

    # Critic's extra hidden layer.
    c3 = jnp.tanh(
        jnp.dot(c2, w3c_ref[...], preferred_element_type=jnp.float32) + b3c_ref[...]
    )

    # Fused head: one (TILE_B, 256) x (256, 128) matmul producing a lane-dense
    # slab with logits in lanes [0:action_size] and the value in lane action_size.
    head_in = jnp.concatenate([h2, c3], axis=-1)
    head = (
        jnp.dot(head_in, wh_ref[...], preferred_element_type=jnp.float32)
        + bh_ref[...]
    )

    lane = jax.lax.broadcasted_iota(jnp.int32, head.shape, 1)
    is_logit = lane < action_size
    is_value = lane == action_size

    # Masked softmax over the logit lanes only (padded lanes excluded).
    masked_logits = jnp.where(is_logit, head, jnp.float32(-jnp.inf))
    m = jnp.max(masked_logits, axis=-1, keepdims=True)
    e = jnp.exp(masked_logits - m)                 # padded lanes -> exp(-inf) = 0
    denom = jnp.sum(e, axis=-1, keepdims=True)
    probs = e * pl.reciprocal(denom, approx=False)

    out_ref[...] = jnp.where(
        is_logit, probs, jnp.where(is_value, head, jnp.float32(0.0))
    ).astype(out_ref.dtype)


def non_shared_actor_critic(x, params, *, tile_b=256):
    """x: (B, state_size) float32.  params: dict of (in, out) weights / (1, out) biases."""
    B, state_size = x.shape
    n_hidden = params["aw2"].shape[0]
    action_size = params["aw3"].shape[1]
    head_width = 128
    assert action_size + 1 <= head_width, "packed head needs action_size + 1 <= 128"

    # ---- pack weights (tiny; fused by XLA outside the kernel) ----
    w1 = jnp.concatenate([params["aw1"], params["cw1"]], axis=1)        # (S, 2H)
    b1 = jnp.concatenate([params["ab1"], params["cb1"]], axis=1)        # (1, 2H)
    z = jnp.zeros((n_hidden, n_hidden), jnp.float32)
    w2 = jnp.block([[params["aw2"], z], [z, params["cw2"]]])            # (2H, 2H)
    b2 = jnp.concatenate([params["ab2"], params["cb2"]], axis=1)        # (1, 2H)
    w3c, b3c = params["cw3"], params["cb3"]                             # (H, H), (1, H)
    wh = jnp.zeros((2 * n_hidden, head_width), jnp.float32)
    wh = wh.at[:n_hidden, :action_size].set(params["aw3"])
    wh = wh.at[n_hidden:, action_size:action_size + 1].set(params["cw4"])
    bh = jnp.zeros((1, head_width), jnp.float32)
    bh = bh.at[:, :action_size].set(params["ab3"])
    bh = bh.at[:, action_size:action_size + 1].set(params["cb4"])

    # ---- batch-tiled grid; weights resident via constant index_map ----
    tb = min(tile_b, _round_up(B, 8))
    grid = (pl.cdiv(B, tb),)

    def const(shape):
        return pl.BlockSpec(shape, lambda i: (0, 0))

    packed = pl.pallas_call(
        functools.partial(
            _actor_critic_kernel, action_size=action_size, n_hidden=n_hidden
        ),
        out_shape=jax.ShapeDtypeStruct((B, head_width), jnp.float32),
        grid=grid,
        in_specs=[
            pl.BlockSpec((tb, state_size), lambda i: (i, 0)),
            const((state_size, 2 * n_hidden)), const((1, 2 * n_hidden)),
            const((2 * n_hidden, 2 * n_hidden)), const((1, 2 * n_hidden)),
            const((n_hidden, n_hidden)), const((1, n_hidden)),
            const((2 * n_hidden, head_width)), const((1, head_width)),
        ],
        out_specs=pl.BlockSpec((tb, head_width), lambda i: (i, 0)),
        compiler_params=pltpu.CompilerParams(
            dimension_semantics=("parallel",)
        ),
    )(x, w1, b1, w2, b2, w3c, b3c, wh, bh)

    probs = packed[:, :action_size]
    value = packed[:, action_size]
    return dict(probs=probs, value=value)


def init_params(key, state_size, action_size, n_hidden=128):
    """Deterministic synthetic init (tanh-gain scaled normals, zero biases)."""
    def linear(k, fan_in, fan_out, gain):
        w = gain * jax.random.normal(k, (fan_in, fan_out), jnp.float32) / jnp.sqrt(
            jnp.float32(fan_in)
        )
        b = jnp.zeros((1, fan_out), jnp.float32)
        return w, b

    keys = jax.random.split(key, 7)
    tanh_gain = 5.0 / 3.0
    p = {}
    # actor: state -> 128 -> 128 -> action
    p["aw1"], p["ab1"] = linear(keys[0], state_size, n_hidden, tanh_gain)
    p["aw2"], p["ab2"] = linear(keys[1], n_hidden, n_hidden, tanh_gain)
    p["aw3"], p["ab3"] = linear(keys[2], n_hidden, action_size, 1.0)
    # critic: state -> 128 -> 128 -> 128 -> 1
    p["cw1"], p["cb1"] = linear(keys[3], state_size, n_hidden, tanh_gain)
    p["cw2"], p["cb2"] = linear(keys[4], n_hidden, n_hidden, tanh_gain)
    p["cw3"], p["cb3"] = linear(keys[5], n_hidden, n_hidden, tanh_gain)
    p["cw4"], p["cb4"] = linear(keys[6], n_hidden, 1, 1.0)
    return p


def _reference(x, p):
    """Pure-JAX reference for correctness check."""
    h = jnp.tanh(x @ p["aw1"] + p["ab1"])
    h = jnp.tanh(h @ p["aw2"] + p["ab2"])
    probs = jax.nn.softmax(h @ p["aw3"] + p["ab3"], axis=1)
    c = jnp.tanh(x @ p["cw1"] + p["cb1"])
    c = jnp.tanh(c @ p["cw2"] + p["cb2"])
    c = jnp.tanh(c @ p["cw3"] + p["cb3"])
    value = (c @ p["cw4"] + p["cb4"])[:, 0]
    return probs, value


if __name__ == "__main__":
    key = jax.random.PRNGKey(0)
    k_param, k_x, k_x2 = jax.random.split(key, 3)

    batch = 8
    state_size = 16
    action_size = 6

    params = init_params(k_param, state_size, action_size)

    # --- small batch (single grid step) ---
    x = jax.random.normal(k_x, (batch, state_size), jnp.float32)
    out = jax.jit(non_shared_actor_critic)(x, params)
    jax.block_until_ready(out)

    probs_ref, value_ref = _reference(x, params)
    assert out["probs"].shape == (batch, action_size)
    assert out["value"].shape == (batch,)
    assert jnp.allclose(out["probs"], probs_ref, atol=1e-5, rtol=1e-5)
    assert jnp.allclose(out["value"], value_ref, atol=1e-5, rtol=1e-5)
    assert jnp.allclose(jnp.sum(out["probs"], axis=1), 1.0, atol=1e-5)

    # --- larger batch exercising the batch grid (incl. a partial last block) ---
    batch2 = 200
    x2 = jax.random.normal(k_x2, (batch2, state_size), jnp.float32)
    out2 = jax.jit(functools.partial(non_shared_actor_critic, tile_b=64))(x2, params)
    jax.block_until_ready(out2)

    probs_ref2, value_ref2 = _reference(x2, params)
    assert out2["probs"].shape == (batch2, action_size)
    assert out2["value"].shape == (batch2,)
    assert jnp.allclose(out2["probs"], probs_ref2, atol=1e-5, rtol=1e-5)
    assert jnp.allclose(out2["value"], value_ref2, atol=1e-5, rtol=1e-5)
    assert jnp.allclose(jnp.sum(out2["probs"], axis=1), 1.0, atol=1e-5)

    print("KERNEL_OK")
</pallas_src>

<mosaic_0001>
module attributes {stable_mosaic.version = 11 : i64} {
  func.func @_actor_critic_kernel(%arg0: i32, %arg1: memref<8x16xf32, #tpu.memory_space<vmem>>, %arg2: memref<16x256xf32, #tpu.memory_space<vmem>>, %arg3: memref<1x256xf32, #tpu.memory_space<vmem>>, %arg4: memref<256x256xf32, #tpu.memory_space<vmem>>, %arg5: memref<1x256xf32, #tpu.memory_space<vmem>>, %arg6: memref<128x128xf32, #tpu.memory_space<vmem>>, %arg7: memref<1x128xf32, #tpu.memory_space<vmem>>, %arg8: memref<256x128xf32, #tpu.memory_space<vmem>>, %arg9: memref<1x128xf32, #tpu.memory_space<vmem>>, %arg10: memref<8x128xf32, #tpu.memory_space<vmem>>) attributes {dimension_semantics = [#tpu.dimension_semantics<parallel>], iteration_bounds = array<i64: 1>, scalar_prefetch = 0 : i64, scratch_operands = 0 : i64, tpu.core_type = #tpu.core_type<tc>, window_params = [{transform_indices = @transform_0, window_bounds = array<i64: 8, 16>}, {pipeline_mode = #tpu.pipeline_mode<synchronous>, transform_indices = @transform_1, window_bounds = array<i64: 16, 256>}, {pipeline_mode = #tpu.pipeline_mode<synchronous>, transform_indices = @transform_2, window_bounds = array<i64: 1, 256>}, {pipeline_mode = #tpu.pipeline_mode<synchronous>, transform_indices = @transform_3, window_bounds = array<i64: 256, 256>}, {pipeline_mode = #tpu.pipeline_mode<synchronous>, transform_indices = @transform_4, window_bounds = array<i64: 1, 256>}, {pipeline_mode = #tpu.pipeline_mode<synchronous>, transform_indices = @transform_5, window_bounds = array<i64: 128, 128>}, {pipeline_mode = #tpu.pipeline_mode<synchronous>, transform_indices = @transform_6, window_bounds = array<i64: 1, 128>}, {pipeline_mode = #tpu.pipeline_mode<synchronous>, transform_indices = @transform_7, window_bounds = array<i64: 256, 128>}, {pipeline_mode = #tpu.pipeline_mode<synchronous>, transform_indices = @transform_8, window_bounds = array<i64: 1, 128>}, {transform_indices = @transform_9, window_bounds = array<i64: 8, 128>}]} {
    %c0 = arith.constant 0 : index
    %c0_0 = arith.constant 0 : index
    %0 = vector.load %arg1[%c0, %c0_0] : memref<8x16xf32, #tpu.memory_space<vmem>>, vector<8x16xf32>
    %c0_1 = arith.constant 0 : index
    %c0_2 = arith.constant 0 : index
    %1 = vector.load %arg2[%c0_1, %c0_2] : memref<16x256xf32, #tpu.memory_space<vmem>>, vector<16x256xf32>
    %cst = arith.constant dense<0.000000e+00> : vector<8x256xf32>
    %2 = tpu.matmul %0, %1, %cst {dimension_numbers = #tpu.dot_dimension_numbers<[1], [0], [0], [1], [0, 0, 1, 1], [], []>} : vector<8x16xf32>, vector<16x256xf32>, vector<8x256xf32> -> vector<8x256xf32>
    %c0_3 = arith.constant 0 : index
    %c0_4 = arith.constant 0 : index
    %3 = vector.load %arg3[%c0_3, %c0_4] : memref<1x256xf32, #tpu.memory_space<vmem>>, vector<1x256xf32>
    %4 = vector.broadcast %3 : vector<1x256xf32> to vector<8x256xf32>
    %5 = arith.addf %2, %4 : vector<8x256xf32>
    %6 = math.tanh %5 : vector<8x256xf32>
    %c0_5 = arith.constant 0 : index
    %c0_6 = arith.constant 0 : index
    %7 = vector.load %arg4[%c0_5, %c0_6] : memref<256x256xf32, #tpu.memory_space<vmem>>, vector<256x256xf32>
    %cst_7 = arith.constant dense<0.000000e+00> : vector<8x256xf32>
    %8 = tpu.matmul %6, %7, %cst_7 {dimension_numbers = #tpu.dot_dimension_numbers<[1], [0], [0], [1], [0, 0, 1, 1], [], []>} : vector<8x256xf32>, vector<256x256xf32>, vector<8x256xf32> -> vector<8x256xf32>
    %c0_8 = arith.constant 0 : index
    %c0_9 = arith.constant 0 : index
    %9 = vector.load %arg5[%c0_8, %c0_9] : memref<1x256xf32, #tpu.memory_space<vmem>>, vector<1x256xf32>
    %10 = vector.broadcast %9 : vector<1x256xf32> to vector<8x256xf32>
    %11 = arith.addf %8, %10 : vector<8x256xf32>
    %12 = math.tanh %11 : vector<8x256xf32>
    %13 = vector.extract_strided_slice %12 {offsets = [0, 0], sizes = [8, 128], strides = [1, 1]} : vector<8x256xf32> to vector<8x128xf32>
    %14 = vector.extract_strided_slice %12 {offsets = [0, 128], sizes = [8, 128], strides = [1, 1]} : vector<8x256xf32> to vector<8x128xf32>
    %c0_10 = arith.constant 0 : index
    %c0_11 = arith.constant 0 : index
    %15 = vector.load %arg6[%c0_10, %c0_11] : memref<128x128xf32, #tpu.memory_space<vmem>>, vector<128x128xf32>
    %cst_12 = arith.constant dense<0.000000e+00> : vector<8x128xf32>
    %16 = tpu.matmul %14, %15, %cst_12 {dimension_numbers = #tpu.dot_dimension_numbers<[1], [0], [0], [1], [0, 0, 1, 1], [], []>} : vector<8x128xf32>, vector<128x128xf32>, vector<8x128xf32> -> vector<8x128xf32>
    %c0_13 = arith.constant 0 : index
    %c0_14 = arith.constant 0 : index
    %17 = vector.load %arg7[%c0_13, %c0_14] : memref<1x128xf32, #tpu.memory_space<vmem>>, vector<1x128xf32>
    %18 = vector.broadcast %17 : vector<1x128xf32> to vector<8x128xf32>
    %19 = arith.addf %16, %18 : vector<8x128xf32>
    %20 = math.tanh %19 : vector<8x128xf32>
    %21 = tpu.concatenate %13, %20 in 1 : vector<8x128xf32>, vector<8x128xf32> -> vector<8x256xf32>
    %c0_15 = arith.constant 0 : index
    %c0_16 = arith.constant 0 : index
    %22 = vector.load %arg8[%c0_15, %c0_16] : memref<256x128xf32, #tpu.memory_space<vmem>>, vector<256x128xf32>
    %cst_17 = arith.constant dense<0.000000e+00> : vector<8x128xf32>
    %23 = tpu.matmul %21, %22, %cst_17 {dimension_numbers = #tpu.dot_dimension_numbers<[1], [0], [0], [1], [0, 0, 1, 1], [], []>} : vector<8x256xf32>, vector<256x128xf32>, vector<8x128xf32> -> vector<8x128xf32>
    %c0_18 = arith.constant 0 : index
    %c0_19 = arith.constant 0 : index
    %24 = vector.load %arg9[%c0_18, %c0_19] : memref<1x128xf32, #tpu.memory_space<vmem>>, vector<1x128xf32>
    %25 = vector.broadcast %24 : vector<1x128xf32> to vector<8x128xf32>
    %26 = arith.addf %23, %25 : vector<8x128xf32>
    %27 = tpu.iota {dimensions = array<i32: 1>} : vector<8x128xi32>
    %c6_i32 = arith.constant 6 : i32
    %28 = vector.broadcast %c6_i32 : i32 to vector<8x128xi32>
    %29 = arith.cmpi slt, %27, %28 : vector<8x128xi32>
    %c6_i32_20 = arith.constant 6 : i32
    %30 = vector.broadcast %c6_i32_20 : i32 to vector<8x128xi32>
    %31 = arith.cmpi eq, %27, %30 : vector<8x128xi32>
    %cst_21 = arith.constant 0xFF800000 : f32
    %32 = vector.broadcast %cst_21 : f32 to vector<8x128xf32>
    %33 = arith.select %29, %26, %32 : vector<8x128xi1>, vector<8x128xf32>
    %cst_22 = arith.constant dense<0xFF800000> : vector<8xf32>
    %34 = vector.multi_reduction <maximumf>, %33, %cst_22 [1] : vector<8x128xf32> to vector<8xf32>
    %35 = vector.shape_cast %34 : vector<8xf32> to vector<8x1xf32>
    %36 = vector.broadcast %35 : vector<8x1xf32> to vector<8x128xf32>
    %37 = arith.subf %33, %36 : vector<8x128xf32>
    %38 = math.exp %37 : vector<8x128xf32>
    %cst_23 = arith.constant dense<0.000000e+00> : vector<8xf32>
    %39 = vector.multi_reduction <add>, %38, %cst_23 [1] : vector<8x128xf32> to vector<8xf32>
    %40 = vector.shape_cast %39 : vector<8xf32> to vector<8x1xf32>
    %41 = tpu.reciprocal %40 : vector<8x1xf32> -> vector<8x1xf32>
    %42 = vector.broadcast %41 : vector<8x1xf32> to vector<8x128xf32>
    %43 = arith.mulf %38, %42 : vector<8x128xf32>
    %cst_24 = arith.constant 0.000000e+00 : f32
    %44 = vector.broadcast %cst_24 : f32 to vector<8x128xf32>
    %45 = arith.select %31, %26, %44 : vector<8x128xi1>, vector<8x128xf32>
    %46 = arith.select %29, %43, %45 : vector<8x128xi1>, vector<8x128xf32>
    %c0_25 = arith.constant 0 : index
    %c0_26 = arith.constant 0 : index
    %47 = vector.load %arg10[%c0_25, %c0_26] : memref<8x128xf32, #tpu.memory_space<vmem>>, vector<8x128xf32>
    tpu.vector_store %arg10[%c0_25, %c0_26], %46 {strides = array<i32>} : memref<8x128xf32, #tpu.memory_space<vmem>>, vector<8x128xf32>,
    return
  }
  func.func @transform_0(%arg0: i32) -> (i32, i32) {
    %c0_i32 = arith.constant 0 : i32
    %c0_i32_0 = arith.constant 0 : i32
    return %arg0, %c0_i32 : i32, i32
  }
  func.func @transform_1(%arg0: i32) -> (i32, i32) {
    %c0_i32 = arith.constant 0 : i32
    %c0_i32_0 = arith.constant 0 : i32
    %c0_i32_1 = arith.constant 0 : i32
    return %c0_i32, %c0_i32_0 : i32, i32
  }
  func.func @transform_2(%arg0: i32) -> (i32, i32) {
    %c0_i32 = arith.constant 0 : i32
    %c0_i32_0 = arith.constant 0 : i32
    %c0_i32_1 = arith.constant 0 : i32
    return %c0_i32, %c0_i32_0 : i32, i32
  }
  func.func @transform_3(%arg0: i32) -> (i32, i32) {
    %c0_i32 = arith.constant 0 : i32
    %c0_i32_0 = arith.constant 0 : i32
    %c0_i32_1 = arith.constant 0 : i32
    return %c0_i32, %c0_i32_0 : i32, i32
  }
  func.func @transform_4(%arg0: i32) -> (i32, i32) {
    %c0_i32 = arith.constant 0 : i32
    %c0_i32_0 = arith.constant 0 : i32
    %c0_i32_1 = arith.constant 0 : i32
    return %c0_i32, %c0_i32_0 : i32, i32
  }
  func.func @transform_5(%arg0: i32) -> (i32, i32) {
    %c0_i32 = arith.constant 0 : i32
    %c0_i32_0 = arith.constant 0 : i32
    %c0_i32_1 = arith.constant 0 : i32
    return %c0_i32, %c0_i32_0 : i32, i32
  }
  func.func @transform_6(%arg0: i32) -> (i32, i32) {
    %c0_i32 = arith.constant 0 : i32
    %c0_i32_0 = arith.constant 0 : i32
    %c0_i32_1 = arith.constant 0 : i32
    return %c0_i32, %c0_i32_0 : i32, i32
  }
  func.func @transform_7(%arg0: i32) -> (i32, i32) {
    %c0_i32 = arith.constant 0 : i32
    %c0_i32_0 = arith.constant 0 : i32
    %c0_i32_1 = arith.constant 0 : i32
    return %c0_i32, %c0_i32_0 : i32, i32
  }
  func.func @transform_8(%arg0: i32) -> (i32, i32) {
    %c0_i32 = arith.constant 0 : i32
    %c0_i32_0 = arith.constant 0 : i32
    %c0_i32_1 = arith.constant 0 : i32
    return %c0_i32, %c0_i32_0 : i32, i32
  }
  func.func @transform_9(%arg0: i32) -> (i32, i32) {
    %c0_i32 = arith.constant 0 : i32
    %c0_i32_0 = arith.constant 0 : i32
    return %arg0, %c0_i32 : i32, i32
  }
}

</mosaic_0001>

<bundles_post_ra>
// kernel: non_shared_actor_critic.1
= control target key start
LH: loop header
LB: loop body
LE: loop exit
PB: predicated region body
PF: predicated region fallthrough
CT: control target
= control target key end

     0   :  { %v605_v3 = vmov 0.0   ;;  %vm49_vm0 = vcmask 130048   ;;  %vm606_vm1 = vmmov 0   ;;  %s1060_s1 = inlined_call_operand.vmem [shape: f32[16,256], index: 1, kind: input, shape index: {}]   ;;  %s1061_s0 = inlined_call_operand.vmem [shape: f32[8,16], index: 0, kind: input, shape index: {}]   ;;  %s1062_s3 = inlined_call_operand.vmem [shape: f32[256,256], index: 3, kind: input, shape index: {}]   ;;  %s1063_s5 = inlined_call_operand.vmem [shape: f32[128,128], index: 5, kind: input, shape index: {}]   ;;  %s1064_s2 = inlined_call_operand.vmem [shape: f32[1,256], index: 2, kind: input, shape index: {}]   ;;  %s1065_s7 = inlined_call_operand.vmem [shape: f32[256,128], index: 7, kind: input, shape index: {}]   ;;  %s1066_s4 = inlined_call_operand.vmem [shape: f32[1,256], index: 4, kind: input, shape index: {}]   ;;  %s1067_s6 = inlined_call_operand.vmem [shape: f32[1,128], index: 6, kind: input, shape index: {}]   ;;  %s1068_s8 = inlined_call_operand.vmem [shape: f32[1,128], index: 8, kind: input, shape index: {}]   ;;  %s1069_s9 = inlined_call_operand.vmem [shape: f32[8,128], index: 9, kind: output, shape index: {}]  }
   0x1   :  { %v36_v0 = vld [vmem:[%s1060_s1 + $0x18] sm:$0xff]  ;;  %v35_v1 = vld [vmem:[%s1060_s1 + $0x10] sm:$0xff]  ;;  %v34_v2 = vld [vmem:[%s1060_s1 + $0x8] sm:$0xff]  ;;  %117 = vmatprep.mubr.f32.mxu0 %v605_v3 }
   0x2   :  { %81 = vmatprep.subr.mxu0 %v36_v0  ;;  %v33_v4 = vld [vmem:[%s1060_s1] sm:$0xff]  ;;  %v157_v6 = vld [vmem:[%s1062_s3 + $0xf8] sm:$0xff]  ;;  %v156_v7 = vld [vmem:[%s1062_s3 + $0xf0] sm:$0xff] }
   0x3   :  { %v32_v5 = vld [vmem:[%s1061_s0] sm:$0xff]  ;;  %82 = vmatpush1.msra.mxu0 %v35_v1  ;;  %202 = vmatprep.subr.mxu1 %v157_v6  ;;  %v155_v8 = vld [vmem:[%s1062_s3 + $0xe8] sm:$0xff]  ;;  %v153_v10 = vld [vmem:[%s1062_s3 + $0xd8] sm:$0xff] }
   0x4   :  { %v154_v9 = vld [vmem:[%s1062_s3 + $0xe0] sm:$0xff]  ;;  %83 = vmatprep.subr.mxu0 %v34_v2  ;;  %203 = vmatpush1.msra.mxu1 %v156_v7  ;;  %v152_v11 = vld [vmem:[%s1062_s3 + $0xd0] sm:$0xff]  ;;  %v151_v12 = vld [vmem:[%s1062_s3 + $0xc8] sm:$0xff] }
   0x5   :  { %84 = vmatpush1.msra.mxu0 %v33_v4  ;;  %204 = vmatprep.subr.mxu1 %v155_v8  ;;  %v150_v13 = vld [vmem:[%s1062_s3 + $0xc0] sm:$0xff]  ;;  %v149_v14 = vld [vmem:[%s1062_s3 + $0xb8] sm:$0xff]  ;;  %v148_v15 = vld [vmem:[%s1062_s3 + $0xb0] sm:$0xff] }
   0x6   :  { %499 = vmatmul.mubr.msk.f32.vlgmr.msra.gmra.mxu0 %vm49_vm0, %v32_v5  ;;  %205 = vmatpush1.msra.mxu1 %v154_v9  ;;  %v147_v16 = vld [vmem:[%s1062_s3 + $0xa8] sm:$0xff]  ;;  %v146_v17 = vld [vmem:[%s1062_s3 + $0xa0] sm:$0xff]  ;;  %v145_v18 = vld [vmem:[%s1062_s3 + $0x98] sm:$0xff] }
   0x7   :  { %206 = vmatprep.subr.mxu1 %v153_v10  ;;  %554 = vmatprep.subr.mxu0 %v605_v3  ;;  %v144_v19 = vld [vmem:[%s1062_s3 + $0x90] sm:$0xff]  ;;  %v143_v20 = vld [vmem:[%s1062_s3 + $0x88] sm:$0xff]  ;;  %v142_v21 = vld [vmem:[%s1062_s3 + $0x80] sm:$0xff] }
   0x8   :  { %207 = vmatpush1.msra.mxu1 %v152_v11  ;;  %v141_v22 = vld [vmem:[%s1062_s3 + $0x78] sm:$0xff]  ;;  %v140_v23 = vld [vmem:[%s1062_s3 + $0x70] sm:$0xff]  ;;  %v139_v24 = vld [vmem:[%s1062_s3 + $0x68] sm:$0xff]  ;;  %586 = vmatprep.mubr.msk.f32.mxu0 %vm606_vm1, %v605_v3 }
   0x9   :  { %208 = vmatprep.subr.mxu1 %v151_v12  ;;  %v138_v25 = vld [vmem:[%s1062_s3 + $0x60] sm:$0xff]  ;;  %v137_v26 = vld [vmem:[%s1062_s3 + $0x58] sm:$0xff]  ;;  %v136_v27 = vld [vmem:[%s1062_s3 + $0x50] sm:$0xff] }
   0xa   :  { %209 = vmatpush1.msra.mxu1 %v150_v13  ;;  %v135_v28 = vld [vmem:[%s1062_s3 + $0x48] sm:$0xff]  ;;  %v134_v29 = vld [vmem:[%s1062_s3 + $0x40] sm:$0xff]  ;;  %v133_v30 = vld [vmem:[%s1062_s3 + $0x38] sm:$0xff]  ;;  %v39_v13 = vlaneseq }
   0xb   :  { %210 = vmatprep.subr.mxu1 %v149_v14  ;;  %v132_v31 = vld [vmem:[%s1062_s3 + $0x30] sm:$0xff]  ;;  %v131_v32 = vld [vmem:[%s1062_s3 + $0x28] sm:$0xff]  ;;  %v130_v33 = vld [vmem:[%s1062_s3 + $0x20] sm:$0xff] }
   0xc   :  { %211 = vmatpush1.msra.mxu1 %v148_v15  ;;  %v129_v34 = vld [vmem:[%s1062_s3 + $0x18] sm:$0xff]  ;;  %v128_v35 = vld [vmem:[%s1062_s3 + $0x10] sm:$0xff]  ;;  %v127_v36 = vld [vmem:[%s1062_s3 + $0x8] sm:$0xff]  ;;  %v891_v14 = vshrl.u32 %v39_v13, 7 }
   0xd   :  { %212 = vmatprep.subr.mxu1 %v147_v16  ;;  %v126_v37 = vld [vmem:[%s1062_s3] sm:$0xff]  ;;  %v189_v38 = vld [vmem:[%s1062_s3 + $0x1f8] sm:$0xff]  ;;  %v188_v39 = vld [vmem:[%s1062_s3 + $0x1f0] sm:$0xff] }
   0xe   :  { %213 = vmatpush1.msra.mxu1 %v146_v17  ;;  %v187_v40 = vld [vmem:[%s1062_s3 + $0x1e8] sm:$0xff]  ;;  %v186_v41 = vld [vmem:[%s1062_s3 + $0x1e0] sm:$0xff]  ;;  %v185_v42 = vld [vmem:[%s1062_s3 + $0x1d8] sm:$0xff]  ;;  %v41_v15 = vsub.s32 0, %v891_v14  ;;  %v45_v17 = vsub.s32 1, %v891_v14  ;;  %v479_v14 = vand.u32 127, %v39_v13 }
   0xf   :  { %214 = vmatprep.subr.mxu1 %v145_v18  ;;  %v184_v43 = vld [vmem:[%s1062_s3 + $0x1d0] sm:$0xff]  ;;  %v183_v44 = vld [vmem:[%s1062_s3 + $0x1c8] sm:$0xff]  ;;  %v182_v45 = vld [vmem:[%s1062_s3 + $0x1c0] sm:$0xff] }
  0x10   :  { %215 = vmatpush1.msra.mxu1 %v144_v19  ;;  %v181_v46 = vld [vmem:[%s1062_s3 + $0x1b8] sm:$0xff]  ;;  %v180_v47 = vld [vmem:[%s1062_s3 + $0x1b0] sm:$0xff]  ;;  %v179_v48 = vld [vmem:[%s1062_s3 + $0x1a8] sm:$0xff]  ;;  %vm480_vm2 = vcmp.lt.s32.totalorder %v479_v14, 6  ;;  %vm481_vm3 = vcmp.eq.s32.totalorder %v479_v14, 6 }
  0x11   :  { %216 = vmatprep.subr.mxu1 %v143_v20  ;;  %v178_v49 = vld [vmem:[%s1062_s3 + $0x1a0] sm:$0xff]  ;;  %v177_v50 = vld [vmem:[%s1062_s3 + $0x198] sm:$0xff]  ;;  %v176_v51 = vld [vmem:[%s1062_s3 + $0x190] sm:$0xff] }
  0x12   :  { %217 = vmatpush1.msra.mxu1 %v142_v21  ;;  %v175_v52 = vld [vmem:[%s1062_s3 + $0x188] sm:$0xff]  ;;  %v174_v53 = vld [vmem:[%s1062_s3 + $0x180] sm:$0xff]  ;;  %v173_v54 = vld [vmem:[%s1062_s3 + $0x178] sm:$0xff] }
  0x13   :  { %218 = vmatprep.subr.mxu1 %v141_v22  ;;  %v172_v55 = vld [vmem:[%s1062_s3 + $0x170] sm:$0xff]  ;;  %v171_v56 = vld [vmem:[%s1062_s3 + $0x168] sm:$0xff]  ;;  %v170_v57 = vld [vmem:[%s1062_s3 + $0x160] sm:$0xff] }
  0x14   :  { %219 = vmatpush1.msra.mxu1 %v140_v23  ;;  %v169_v58 = vld [vmem:[%s1062_s3 + $0x158] sm:$0xff]  ;;  %v168_v59 = vld [vmem:[%s1062_s3 + $0x150] sm:$0xff]  ;;  %v167_v60 = vld [vmem:[%s1062_s3 + $0x148] sm:$0xff] }
  0x15   :  { %220 = vmatprep.subr.mxu1 %v139_v24  ;;  %v166_v61 = vld [vmem:[%s1062_s3 + $0x140] sm:$0xff]  ;;  %v165_v62 = vld [vmem:[%s1062_s3 + $0x138] sm:$0xff]  ;;  %v164_v63 = vld [vmem:[%s1062_s3 + $0x130] sm:$0xff] }
  0x16   :  { %221 = vmatpush1.msra.mxu1 %v138_v25  ;;  %v163_v0 = vld [vmem:[%s1062_s3 + $0x128] sm:$0xff]  ;;  %v162_v1 = vld [vmem:[%s1062_s3 + $0x120] sm:$0xff]  ;;  %v161_v2 = vld [vmem:[%s1062_s3 + $0x118] sm:$0xff] }
  0x17   :  { %222 = vmatprep.subr.mxu1 %v137_v26  ;;  %v160_v4 = vld [vmem:[%s1062_s3 + $0x110] sm:$0xff]  ;;  %v159_v5 = vld [vmem:[%s1062_s3 + $0x108] sm:$0xff]  ;;  %v158_v6 = vld [vmem:[%s1062_s3 + $0x100] sm:$0xff] }
  0x18   :  { %223 = vmatpush1.msra.mxu1 %v136_v27  ;;  %v290_v7 = vld [vmem:[%s1063_s5 + $0x78] sm:$0xff]  ;;  %v289_v8 = vld [vmem:[%s1063_s5 + $0x70] sm:$0xff]  ;;  %v288_v9 = vld [vmem:[%s1063_s5 + $0x68] sm:$0xff] }
  0x19   :  { %224 = vmatprep.subr.mxu1 %v135_v28  ;;  %555 = vmatpush3.msra.mxu0 %v290_v7  ;;  %v287_v10 = vld [vmem:[%s1063_s5 + $0x60] sm:$0xff]  ;;  %v286_v11 = vld [vmem:[%s1063_s5 + $0x58] sm:$0xff]  ;;  %v285_v12 = vld [vmem:[%s1063_s5 + $0x50] sm:$0xff] }
  0x1a   :  { %225 = vmatpush1.msra.mxu1 %v134_v29  ;;  %556 = vmatprep.subr.mxu0 %v605_v3  ;;  %v37_v16 = vld [vmem:[%s1064_s2] sm:$0x3]  ;;  %v284_v26 = vld [vmem:[%s1063_s5 + $0x48] sm:$0xff]  ;;  %v282_v28 = vld [vmem:[%s1063_s5 + $0x38] sm:$0xff] }
  0x1b   :  { %226 = vmatprep.subr.mxu1 %v133_v30  ;;  %557 = vmatpush3.msra.mxu0 %v289_v8  ;;  %v42_v18 = vrot.slane %v37_v16, %v41_v15  ;;  %v46_v19 = vrot.slane %v37_v16, %v45_v17  ;;  %v283_v27 = vld [vmem:[%s1063_s5 + $0x40] sm:$0xff]  ;;  %v281_v29 = vld [vmem:[%s1063_s5 + $0x30] sm:$0xff]  ;;  %v280_v30 = vld [vmem:[%s1063_s5 + $0x28] sm:$0xff] }
  0x1c   :  { %227 = vmatpush1.msra.mxu1 %v132_v31  ;;  %558 = vmatprep.subr.mxu0 %v605_v3  ;;  %v279_v31 = vld [vmem:[%s1063_s5 + $0x20] sm:$0xff]  ;;  %v370_v7 = vld [vmem:[%s1065_s7 + $0x8] sm:$0xff] }
  0x1d   :  { %228 = vmatprep.subr.mxu1 %v131_v32  ;;  %559 = vmatpush3.msra.mxu0 %v288_v9  ;;  %v278_v32 = vld [vmem:[%s1063_s5 + $0x18] sm:$0xff]  ;;  %v385_v8 = vld [vmem:[%s1065_s7 + $0x80] sm:$0xff] }
  0x1e   :  { %229 = vmatpush1.msra.mxu1 %v130_v33  ;;  %560 = vmatprep.subr.mxu0 %v605_v3  ;;  %v277_v33 = vld [vmem:[%s1063_s5 + $0x10] sm:$0xff]  ;;  %v369_v9 = vld [vmem:[%s1065_s7] sm:$0xff] }
  0x1f   :  { %230 = vmatprep.subr.mxu1 %v129_v34  ;;  %561 = vmatpush3.msra.mxu0 %v287_v10  ;;  %v276_v34 = vld [vmem:[%s1063_s5 + $0x8] sm:$0xff] }
  0x20   :  { %231 = vmatpush1.msra.mxu1 %v128_v35  ;;  %562 = vmatprep.subr.mxu0 %v605_v3  ;;  %v275_v35 = vld [vmem:[%s1063_s5] sm:$0xff] }
  0x21   :  { %232 = vmatprep.subr.mxu1 %v127_v36  ;;  %563 = vmatpush3.msra.mxu0 %v286_v11  ;;  %v400_v36 = vld [vmem:[%s1065_s7 + $0xf8] sm:$0xff]  ;;  %v500_v11 = vld [vmem:[%s1067_s6] ss:$0 sm:$0xff] }
  0x22   :  { %233 = vmatpush1.msra.mxu1 %v126_v37  ;;  %564 = vmatprep.subr.mxu0 %v605_v3  ;;  %v946_v37 = vld [vmem:[%s1066_s4] sm:$0x3] }
  0x23   :  { %234 = vmatprep.subr.mxu1 %v189_v38  ;;  %565 = vmatpush3.msra.mxu0 %v285_v12  ;;  %v199_v38 = vrot.slane %v946_v37, %v45_v17  ;;  %v195_v10 = vrot.slane %v946_v37, %v41_v15  ;;  %v501_v15 = vld [vmem:[%s1068_s8] ss:$0 sm:$0xff] }
  0x24   :  { %235 = vmatpush2.msra.mxu1 %v188_v39  ;;  %566 = vmatprep.subr.mxu0 %v605_v3 }
  0x25   :  { %236 = vmatprep.subr.mxu1 %v187_v40  ;;  %567 = vmatpush3.msra.mxu0 %v284_v26 }
  0x26   :  { %237 = vmatpush2.msra.mxu1 %v186_v41  ;;  %568 = vmatprep.subr.mxu0 %v605_v3 }
  0x27   :  { %238 = vmatprep.subr.mxu1 %v185_v42  ;;  %569 = vmatpush3.msra.mxu0 %v283_v27 }
  0x28   :  { %239 = vmatpush2.msra.mxu1 %v184_v43  ;;  %570 = vmatprep.subr.mxu0 %v605_v3  ;;  %v399_v43 = vld [vmem:[%s1065_s7 + $0xf0] sm:$0xff] }
  0x29   :  { %240 = vmatprep.subr.mxu1 %v183_v44  ;;  %571 = vmatpush3.msra.mxu0 %v282_v28  ;;  %v383_v44 = vld [vmem:[%s1065_s7 + $0x70] sm:$0xff] }
  0x2a   :  { %241 = vmatpush2.msra.mxu1 %v182_v45  ;;  %572 = vmatprep.subr.mxu0 %v605_v3  ;;  %v398_v45 = vld [vmem:[%s1065_s7 + $0xe8] sm:$0xff] }
  0x2b   :  { %242 = vmatprep.subr.mxu1 %v181_v46  ;;  %573 = vmatpush3.msra.mxu0 %v281_v29  ;;  %v382_v46 = vld [vmem:[%s1065_s7 + $0x68] sm:$0xff] }
  0x2c   :  { %243 = vmatpush2.msra.mxu1 %v180_v47  ;;  %574 = vmatprep.subr.mxu0 %v605_v3  ;;  %v397_v47 = vld [vmem:[%s1065_s7 + $0xe0] sm:$0xff] }
  0x2d   :  { %244 = vmatprep.subr.mxu1 %v179_v48  ;;  %575 = vmatpush3.msra.mxu0 %v280_v30  ;;  %v381_v48 = vld [vmem:[%s1065_s7 + $0x60] sm:$0xff] }
  0x2e   :  { %245 = vmatpush2.msra.mxu1 %v178_v49  ;;  %576 = vmatprep.subr.mxu0 %v605_v3  ;;  %v396_v49 = vld [vmem:[%s1065_s7 + $0xd8] sm:$0xff] }
  0x2f   :  { %246 = vmatprep.subr.mxu1 %v177_v50  ;;  %577 = vmatpush3.msra.mxu0 %v279_v31  ;;  %v380_v50 = vld [vmem:[%s1065_s7 + $0x58] sm:$0xff] }
  0x30   :  { %247 = vmatpush2.msra.mxu1 %v176_v51  ;;  %578 = vmatprep.subr.mxu0 %v605_v3  ;;  %v395_v51 = vld [vmem:[%s1065_s7 + $0xd0] sm:$0xff] }
  0x31   :  { %248 = vmatprep.subr.mxu1 %v175_v52  ;;  %579 = vmatpush3.msra.mxu0 %v278_v32  ;;  %v379_v52 = vld [vmem:[%s1065_s7 + $0x50] sm:$0xff] }
  0x32   :  { %249 = vmatpush2.msra.mxu1 %v174_v53  ;;  %580 = vmatprep.subr.mxu0 %v605_v3  ;;  %v394_v53 = vld [vmem:[%s1065_s7 + $0xc8] sm:$0xff] }
  0x33   :  { %250 = vmatprep.subr.mxu1 %v173_v54  ;;  %581 = vmatpush3.msra.mxu0 %v277_v33  ;;  %v378_v54 = vld [vmem:[%s1065_s7 + $0x48] sm:$0xff] }
  0x34   :  { %251 = vmatpush2.msra.mxu1 %v172_v55  ;;  %582 = vmatprep.subr.mxu0 %v605_v3  ;;  %v393_v55 = vld [vmem:[%s1065_s7 + $0xc0] sm:$0xff] }
  0x35   :  { %252 = vmatprep.subr.mxu1 %v171_v56  ;;  %583 = vmatpush3.msra.mxu0 %v276_v34  ;;  %v377_v56 = vld [vmem:[%s1065_s7 + $0x40] sm:$0xff] }
  0x36   :  { %253 = vmatpush2.msra.mxu1 %v170_v57  ;;  %584 = vmatprep.subr.mxu0 %v605_v3  ;;  %v384_v3 = vld [vmem:[%s1065_s7 + $0x78] sm:$0xff] }
  0x37   :  { %254 = vmatprep.subr.mxu1 %v169_v58  ;;  %585 = vmatpush3.msra.mxu0 %v275_v35  ;;  %v392_v57 = vld [vmem:[%s1065_s7 + $0xb8] sm:$0xff] }
  0x38   :  { %255 = vmatpush2.msra.mxu1 %v168_v59  ;;  %519 = vmatprep.subr.mxu0 %v400_v36  ;;  %v376_v58 = vld [vmem:[%s1065_s7 + $0x38] sm:$0xff]  ;;  %v391_v59 = vld [vmem:[%s1065_s7 + $0xb0] sm:$0xff] }
  0x39   :  { %256 = vmatprep.subr.mxu1 %v167_v60  ;;  %v375_v60 = vld [vmem:[%s1065_s7 + $0x30] sm:$0xff] }
  0x3a   :  { %257 = vmatpush2.msra.mxu1 %v166_v61  ;;  %v390_v61 = vld [vmem:[%s1065_s7 + $0xa8] sm:$0xff] }
  0x3b   :  { %258 = vmatprep.subr.mxu1 %v165_v62  ;;  %v374_v62 = vld [vmem:[%s1065_s7 + $0x28] sm:$0xff] }
  0x3c   :  { %259 = vmatpush2.msra.mxu1 %v164_v63  ;;  %v389_v63 = vld [vmem:[%s1065_s7 + $0xa0] sm:$0xff] }
  0x3d   :  { %260 = vmatprep.subr.mxu1 %v163_v0  ;;  %v373_v0 = vld [vmem:[%s1065_s7 + $0x20] sm:$0xff] }
  0x3e   :  { %261 = vmatpush2.msra.mxu1 %v162_v1  ;;  %v388_v1 = vld [vmem:[%s1065_s7 + $0x98] sm:$0xff] }
  0x3f   :  { %262 = vmatprep.subr.mxu1 %v161_v2  ;;  %v372_v2 = vld [vmem:[%s1065_s7 + $0x18] sm:$0xff] }
  0x40   :  { %263 = vmatpush2.msra.mxu1 %v160_v4  ;;  %v387_v4 = vld [vmem:[%s1065_s7 + $0x90] sm:$0xff] }
  0x41   :  { %264 = vmatprep.subr.mxu1 %v159_v5  ;;  %v371_v5 = vld [vmem:[%s1065_s7 + $0x10] sm:$0xff] }
  0x42   :  { %265 = vmatpush2.msra.mxu1 %v158_v6  ;;  %v386_v6 = vld [vmem:[%s1065_s7 + $0x88] sm:$0xff] }
  0xc6   :  { %v119_v20 = vpop.f32.mrf.mxu0 }
  0xc7   :  { %v120_v21 = vadd.f32 %v119_v20, %v42_v18 }
  0xc8   :  { %v121_v22 = vpop.f32.mrf.mxu0 }
  0xc9   :  { %v122_v23 = vadd.f32 %v121_v22, %v46_v19 }
  0xcb   :  { %591 = vtanh.f32 %v122_v23 }
  0xcc   :  { %593 = vtanh.f32 %v120_v21 }
  0xd8   :  { %v592_v24 = vpop.eup %591 }
  0xd9   :  { %v594_v25 = vpop.eup %593  ;;  %266 = vmatprep.mubr.f32.mxu1 %v592_v24 }
  0xda   :  { %267 = vmatmul.mubr.f32.vlgmr.msra.gmra.mxu1 %v594_v25 }
 0x19a   :  { %v949_v39 = vpop.f32.mrf.mxu1 }
 0x19b   :  { %v269_v12 = vadd.f32 %v949_v39, %v195_v10 }
 0x19c   :  { %v270_v40 = vpop.f32.mrf.mxu1 }
 0x19d   :  { %v271_v41 = vadd.f32 %v270_v40, %v199_v38 }
 0x19f   :  { %595 = vtanh.f32 %v271_v41 }
 0x1ac   :  { %v596_v42 = vpop.eup %595 }
 0x1ad   :  { %587 = vmatmul.mubr.f32.vlgmr.msra.gmra.mxu0 %v596_v42 }
 0x1ae   :  { %520 = vmatpush3.msra.mxu0 %v384_v3 }
 0x1af   :  { %521 = vmatprep.subr.mxu0 %v399_v43 }
 0x1b0   :  { %522 = vmatpush3.msra.mxu0 %v383_v44 }
 0x1b1   :  { %523 = vmatprep.subr.mxu0 %v398_v45 }
 0x1b2   :  { %524 = vmatpush3.msra.mxu0 %v382_v46 }
 0x1b3   :  { %525 = vmatprep.subr.mxu0 %v397_v47 }
 0x1b4   :  { %526 = vmatpush3.msra.mxu0 %v381_v48 }
 0x1b5   :  { %527 = vmatprep.subr.mxu0 %v396_v49 }
 0x1b6   :  { %528 = vmatpush3.msra.mxu0 %v380_v50 }
 0x1b7   :  { %529 = vmatprep.subr.mxu0 %v395_v51 }
 0x1b8   :  { %530 = vmatpush3.msra.mxu0 %v379_v52 }
 0x1b9   :  { %531 = vmatprep.subr.mxu0 %v394_v53 }
 0x1ba   :  { %532 = vmatpush3.msra.mxu0 %v378_v54 }
 0x1bb   :  { %533 = vmatprep.subr.mxu0 %v393_v55 }
 0x1bc   :  { %534 = vmatpush3.msra.mxu0 %v377_v56 }
 0x1bd   :  { %535 = vmatprep.subr.mxu0 %v392_v57 }
 0x1be   :  { %536 = vmatpush3.msra.mxu0 %v376_v58 }
 0x1bf   :  { %537 = vmatprep.subr.mxu0 %v391_v59 }
 0x1c0   :  { %538 = vmatpush3.msra.mxu0 %v375_v60 }
 0x1c1   :  { %539 = vmatprep.subr.mxu0 %v390_v61 }
 0x1c2   :  { %540 = vmatpush3.msra.mxu0 %v374_v62 }
 0x1c3   :  { %541 = vmatprep.subr.mxu0 %v389_v63 }
 0x1c4   :  { %542 = vmatpush3.msra.mxu0 %v373_v0 }
 0x1c5   :  { %543 = vmatprep.subr.mxu0 %v388_v1 }
 0x1c6   :  { %544 = vmatpush3.msra.mxu0 %v372_v2 }
 0x1c7   :  { %545 = vmatprep.subr.mxu0 %v387_v4 }
 0x1c8   :  { %546 = vmatpush3.msra.mxu0 %v371_v5 }
 0x1c9   :  { %547 = vmatprep.subr.mxu0 %v386_v6 }
 0x1ca   :  { %548 = vmatpush3.msra.mxu0 %v370_v7 }
 0x1cb   :  { %549 = vmatprep.subr.mxu0 %v385_v8 }
 0x1cc   :  { %550 = vmatpush3.msra.mxu0 %v369_v9 }
 0x26d   :  { %v364_v16 = vpop.f32.mrf.mxu0 }
 0x26e   :  { %v365_v17 = vadd.f32 %v500_v11, %v364_v16 }
 0x26f   :  { %v588_v18 = vpop.f32.mrf.mxu0 }
 0x270   :  { %597 = vtanh.f32 %v365_v17 }
 0x271   :  { %599 = vtanh.f32 %v269_v12 }
 0x27d   :  { %v598_v19 = vpop.eup %597 }
 0x27e   :  { %v600_v20 = vpop.eup %599  ;;  %472 = vmatprep.mubr.f32.mxu0 %v598_v19 }
 0x27f   :  { %473 = vmatmul.mubr.f32.vlgmr.msra.gmra.mxu0 %v600_v20 }
 0x33f   :  { %v551_v21 = vpop.f32.mrf.mxu0 }
 0x341   :  { %v552_v22 = vpop.f32.mrf.mxu0 }
 0x342   :  { %v553_v23 = vadd.f32 %v552_v22, %v551_v21 }
 0x344   :  { %v475_v24 = vadd.f32 %v553_v23, %v501_v15 }
 0x346   :  { %v482_v25 = vsel %vm480_vm2, %v475_v24, -inf  ;;  %v492_v26 = vsel %vm481_vm3, %v475_v24, 0.0 }
 0x347   :  { %483 = vmax.xlane.f32.xlu0 %v482_v25 }
 0x3d0   :  { %v484_v27 = vpop.xlane.xlu0 %483 }
 0x3d1   :  { %v485_v28 = vsub.f32 %v482_v25, %v484_v27 }
 0x3d3   :  { %v486_v29 = vmul.f32 1.442695, %v485_v28 }
 0x3d5   :  { %601 = vpow2.f32 %v486_v29 }
 0x3e2   :  { %v602_v30 = vpop.eup %601 }
 0x3e3   :  { %488 = vadd.xlane.f32.xlu0 %v602_v30 }
 0x46c   :  { %v489_v13 = vpop.xlane.xlu0 %488 }
 0x46d   :  { %603 = vrcp.f32 %v489_v13 }
 0x47a   :  { %v604_v31 = vpop.eup %603 }
 0x47b   :  { %v491_v32 = vmul.f32 %v604_v31, %v602_v30 }
 0x47d   :  { %v493_v33 = vsel %vm480_vm2, %v491_v32, %v492_v26 }
 0x47e   :  { %494 = vst [vmem:[%s1069_s9] sm:$0xff] %v493_v33 }

</bundles_post_ra>
